<compile_context>
chip_gen: v5e
topology: v5e:2x2
jax: 0.10.0
libtpu: 0.0.40
codegen_flags: <defaults>
</compile_context>

<pallas_src>
import math

import jax
import jax.numpy as jnp
from jax.experimental import pallas as pl
from jax.experimental.pallas import tpu as pltpu

HID = 40            # hidden features of the NoisyNet
LANES = 128         # lane padding for feature axes
XIN = 8             # fused/padded input width: [s(4), a(1), 1, 1, 0]
ROWS = XIN + LANES  # 136 rows in the packed parameter slab


def noisynet_kernel(x_ref, p_ref, o_ref):
    # Effective noisy parameters: mu + sigma * epsilon, one mul + one add per
    # vreg over the whole lane-dense slab (~17 vregs -> negligible VPU work).
    p = p_ref[...]                              # (3, 136, 128)
    w = p[0] + p[1] * p[2]                      # (136, 128) effective params

    x = x_ref[...]                              # (TB, 8): [s | a | 1 | 1 | 0]

    # Layer 1 (+ both biases via the constant-1 input columns), single MXU pass.
    h = jnp.dot(x, w[0:XIN, :], preferred_element_type=jnp.float32)
    h = jnp.maximum(h, 0.0)                     # hidden lane 127 == 1 (bias feed)

    # Layer 2 (+ bias via the constant-1 hidden lane); lane-dense (TB, 128)
    # store — only column 0 is meaningful, wrapper slices it out.
    o_ref[...] = jnp.dot(h, w[XIN:, :], preferred_element_type=jnp.float32)


def _round_up(n, m):
    return ((n + m - 1) // m) * m


def pack_params(params):
    """Repack torch-layout noisy params into one lane-dense (3, 136, 128) slab.

    params = (w1s, b1s, w1a, b1a, w2, b2) with torch nn.Linear layout:
      w-pack (3, out, in) = [weight_mu, weight_sigma, weight_epsilon]
      b-pack (3, 1, out)  = [bias_mu,   bias_sigma,   bias_epsilon]
    Done once at parameter-packing / NoisyNet.sample() time, not per forward.
    """
    w1s, b1s, w1a, b1a, w2, b2 = params
    slab = jnp.zeros((3, ROWS, LANES), jnp.float32)

    # ---- fused layer-1 block (rows 0..7), weights pre-transposed to (in, out)
    slab = slab.at[:, 0:4, 0:HID].set(jnp.swapaxes(w1s, 1, 2))     # (3,4,40)
    slab = slab.at[:, 4:5, 0:HID].set(jnp.swapaxes(w1a, 1, 2))     # (3,1,40)
    # Biases folded in as weight rows hit by the constant-1 input columns 5/6.
    slab = slab.at[:, 5, 0:HID].set(b1s[:, 0, :])                  # fc1_s.bias
    slab = slab.at[:, 6, 0:HID].set(b1a[:, 0, :])                  # fc1_a.bias
    # Constant-1 feed for the layer-2 bias: hidden lane 127 becomes 1 post-ReLU.
    slab = slab.at[0, 5, LANES - 1].set(1.0)                       # mu=1, sig=eps=0

    # ---- layer-2 block (rows 8..135), weights pre-transposed to (in, out)
    slab = slab.at[:, XIN:XIN + HID, 0:1].set(jnp.swapaxes(w2, 1, 2))  # (3,40,1)
    slab = slab.at[:, XIN + LANES - 1, 0:1].set(b2[:, 0, :])           # fc2.bias
    return slab


def noisynet_forward(s, a, packed, *, max_block_rows=512):
    """NoisyNet forward. `packed` = pack_params(...). Returns (B, 1) f32."""
    B = s.shape[0]
    tb = min(max_block_rows, _round_up(B, 8))   # batch rows per grid step (mult of 8)
    bp = _round_up(B, tb)                       # padded batch

    # Fuse s and a into one padded activation:
    # cols 0..3 = s, col 4 = a, cols 5..6 = 1.0 (bias feeds), col 7 = 0.
    x = jnp.zeros((bp, XIN), jnp.float32)
    x = x.at[:B, 0:4].set(s.astype(jnp.float32))
    x = x.at[:B, 4:5].set(a.astype(jnp.float32))
    x = x.at[:B, 5:7].set(1.0)

    grid = (bp // tb,)
    flops = (2 * bp * XIN * LANES          # layer-1 matmul
             + 2 * bp * LANES * LANES      # layer-2 matmul
             + bp * LANES                  # relu
             + 2 * 3 * ROWS * LANES)       # mu + sigma*eps combine
    bytes_accessed = 4 * (x.size + packed.size + bp * LANES)

    out = pl.pallas_call(
        noisynet_kernel,
        out_shape=jax.ShapeDtypeStruct((bp, LANES), jnp.float32),
        grid_spec=pltpu.PrefetchScalarGridSpec(
            num_scalar_prefetch=0,
            grid=grid,
            in_specs=[
                pl.BlockSpec((tb, XIN), lambda i: (i, 0)),            # activations
                pl.BlockSpec((3, ROWS, LANES), lambda i: (0, 0, 0)),  # resident params
            ],
            out_specs=pl.BlockSpec((tb, LANES), lambda i: (i, 0)),
        ),
        compiler_params=pltpu.CompilerParams(
            dimension_semantics=("parallel",)),
        cost_estimate=pl.CostEstimate(
            flops=flops, transcendentals=0, bytes_accessed=bytes_accessed),
    )(x, packed)

    # Lane-dense store inside the kernel; slice back to the true (B, 1) output.
    return out[:B, :1]


def init_noisy_linear(key, in_features, out_features, sigma_init=0.017):
    """Deterministic synthetic init mimicking NoisyLinear(in, out) shapes."""
    k1, k2, k3, k4 = jax.random.split(key, 4)
    bound = math.sqrt(3.0 / in_features)
    w_mu = jax.random.uniform(k1, (out_features, in_features), jnp.float32,
                              -bound, bound)
    b_mu = jax.random.uniform(k2, (out_features,), jnp.float32, -bound, bound)
    w_sigma = jnp.full((out_features, in_features), sigma_init, jnp.float32)
    b_sigma = jnp.full((out_features,), sigma_init, jnp.float32)
    w_eps = jax.random.normal(k3, (out_features, in_features), jnp.float32)
    b_eps = jax.random.normal(k4, (out_features,), jnp.float32)
    w_pack = jnp.stack([w_mu, w_sigma, w_eps])                 # (3, out, in)
    b_pack = jnp.stack([b_mu, b_sigma, b_eps])[:, None, :]     # (3, 1, out)
    return w_pack, b_pack


def reference_forward(s, a, params):
    """Plain-JAX reference of NoisyNet.forward for validation."""
    w1s, b1s, w1a, b1a, w2, b2 = params

    def eff(p):
        return p[0] + p[1] * p[2]

    h = s @ eff(w1s).T + eff(b1s)
    h = h + a @ eff(w1a).T + eff(b1a)
    h = jnp.maximum(h, 0.0)
    return h @ eff(w2).T + eff(b2)


# TODO(synk): NoisyNet.sample() / epsilon resampling is host-side parameter
# generation; it is modeled by the epsilon planes baked into the packed slab
# (re-run pack_params after each sample()).

if __name__ == "__main__":
    key = jax.random.PRNGKey(0)
    k_s, k_a, k1, k2, k3 = jax.random.split(key, 5)

    B = 2
    s = jax.random.normal(k_s, (B, 4), jnp.float32)   # state: (batch, 4)
    a = jax.random.normal(k_a, (B, 1), jnp.float32)   # action: (batch, 1)

    w1s, b1s = init_noisy_linear(k1, 4, 40)    # fc1_s = NoisyLinear(4, 40)
    w1a, b1a = init_noisy_linear(k2, 1, 40)    # fc1_a = NoisyLinear(1, 40)
    w2, b2 = init_noisy_linear(k3, 40, 1)      # fc2   = NoisyLinear(40, 1)
    params = (w1s, b1s, w1a, b1a, w2, b2)

    packed = pack_params(params)               # one-time lane-dense repack

    out = noisynet_forward(s, a, packed)
    out = jax.block_until_ready(out)

    ref = reference_forward(s, a, params)
    assert out.shape == (B, 1), out.shape
    assert jnp.allclose(out, ref, atol=1e-5, rtol=1e-5), (out, ref)

    print("KERNEL_OK")
</pallas_src>

<mosaic_0001>
module attributes {stable_mosaic.version = 11 : i64} {
  func.func @noisynet_kernel(%arg0: i32, %arg1: memref<8x8xf32, #tpu.memory_space<vmem>>, %arg2: memref<3x136x128xf32, #tpu.memory_space<vmem>>, %arg3: memref<8x128xf32, #tpu.memory_space<vmem>>) attributes {dimension_semantics = [#tpu.dimension_semantics<parallel>], iteration_bounds = array<i64: 1>, scalar_prefetch = 0 : i64, scratch_operands = 0 : i64, tpu.core_type = #tpu.core_type<tc>, window_params = [{transform_indices = @transform_0, window_bounds = array<i64: 8, 8>}, {pipeline_mode = #tpu.pipeline_mode<synchronous>, transform_indices = @transform_1, window_bounds = array<i64: 3, 136, 128>}, {transform_indices = @transform_2, window_bounds = array<i64: 8, 128>}]} {
    %c0 = arith.constant 0 : index
    %c0_0 = arith.constant 0 : index
    %c0_1 = arith.constant 0 : index
    %0 = vector.load %arg2[%c0, %c0_0, %c0_1] : memref<3x136x128xf32, #tpu.memory_space<vmem>>, vector<3x136x128xf32>
    %1 = vector.extract_strided_slice %0 {offsets = [0, 0, 0], sizes = [1, 136, 128], strides = [1, 1, 1]} : vector<3x136x128xf32> to vector<1x136x128xf32>
    %2 = vector.shape_cast %1 : vector<1x136x128xf32> to vector<136x128xf32>
    %3 = vector.extract_strided_slice %0 {offsets = [1, 0, 0], sizes = [1, 136, 128], strides = [1, 1, 1]} : vector<3x136x128xf32> to vector<1x136x128xf32>
    %4 = vector.shape_cast %3 : vector<1x136x128xf32> to vector<136x128xf32>
    %5 = vector.extract_strided_slice %0 {offsets = [2, 0, 0], sizes = [1, 136, 128], strides = [1, 1, 1]} : vector<3x136x128xf32> to vector<1x136x128xf32>
    %6 = vector.shape_cast %5 : vector<1x136x128xf32> to vector<136x128xf32>
    %7 = arith.mulf %4, %6 : vector<136x128xf32>
    %8 = arith.addf %2, %7 : vector<136x128xf32>
    %c0_2 = arith.constant 0 : index
    %c0_3 = arith.constant 0 : index
    %9 = vector.load %arg1[%c0_2, %c0_3] : memref<8x8xf32, #tpu.memory_space<vmem>>, vector<8x8xf32>
    %10 = vector.extract_strided_slice %8 {offsets = [0, 0], sizes = [8, 128], strides = [1, 1]} : vector<136x128xf32> to vector<8x128xf32>
    %cst = arith.constant dense<0.000000e+00> : vector<8x128xf32>
    %11 = tpu.matmul %9, %10, %cst {dimension_numbers = #tpu.dot_dimension_numbers<[1], [0], [0], [1], [0, 0, 1, 1], [], []>} : vector<8x8xf32>, vector<8x128xf32>, vector<8x128xf32> -> vector<8x128xf32>
    %cst_4 = arith.constant 0.000000e+00 : f32
    %12 = vector.broadcast %cst_4 : f32 to vector<8x128xf32>
    %13 = arith.maximumf %11, %12 : vector<8x128xf32>
    %14 = vector.extract_strided_slice %8 {offsets = [8, 0], sizes = [128, 128], strides = [1, 1]} : vector<136x128xf32> to vector<128x128xf32>
    %cst_5 = arith.constant dense<0.000000e+00> : vector<8x128xf32>
    %15 = tpu.matmul %13, %14, %cst_5 {dimension_numbers = #tpu.dot_dimension_numbers<[1], [0], [0], [1], [0, 0, 1, 1], [], []>} : vector<8x128xf32>, vector<128x128xf32>, vector<8x128xf32> -> vector<8x128xf32>
    %c0_6 = arith.constant 0 : index
    %c0_7 = arith.constant 0 : index
    %16 = vector.load %arg3[%c0_6, %c0_7] : memref<8x128xf32, #tpu.memory_space<vmem>>, vector<8x128xf32>
    tpu.vector_store %arg3[%c0_6, %c0_7], %15 {strides = array<i32>} : memref<8x128xf32, #tpu.memory_space<vmem>>, vector<8x128xf32>,
    return
  }
  func.func @transform_0(%arg0: i32) -> (i32, i32) {
    %c0_i32 = arith.constant 0 : i32
    %c0_i32_0 = arith.constant 0 : i32
    return %arg0, %c0_i32 : i32, i32
  }
  func.func @transform_1(%arg0: i32) -> (i32, i32, i32) {
    %c0_i32 = arith.constant 0 : i32
    %c0_i32_0 = arith.constant 0 : i32
    %c0_i32_1 = arith.constant 0 : i32
    %c0_i32_2 = arith.constant 0 : i32
    return %c0_i32, %c0_i32_0, %c0_i32_1 : i32, i32, i32
  }
  func.func @transform_2(%arg0: i32) -> (i32, i32) {
    %c0_i32 = arith.constant 0 : i32
    %c0_i32_0 = arith.constant 0 : i32
    return %arg0, %c0_i32 : i32, i32
  }
}

</mosaic_0001>

<bundles_post_ra>
// kernel: tpu_custom_call.1
= control target key start
LH: loop header
LB: loop body
LE: loop exit
PB: predicated region body
PF: predicated region fallthrough
CT: control target
= control target key end

     0   :  { %7 = vsyncpa [#allocation3], 0  ;;  %s305_s0 = inlined_call_operand.hbm [shape: f32[8,8], index: 0, kind: input, shape index: {}]   ;;  %s306_s1 = inlined_call_operand.hbm [shape: f32[3,136,128], index: 1, kind: input, shape index: {}]   ;;  %s307_s2 = inlined_call_operand.hbm [shape: f32[8,128], index: 2, kind: output, shape index: {}]  }
   0x1   :  { %8 = vsyncpa [#allocation6], 0 }
   0x2   :  { %9 = vsyncpa [#allocation4], 0  ;;  %s15_s11 = sshll.u32 %s305_s0, 4  ;;  %s276_s12 = smov [#allocation2]   ;;  %s16_s11 = int_to_ptr.hbm [resolvable:$true] %s15_s11 }
   0x3   :  { %s17_s13 = sshll.u32 %s276_s12, 4  ;;  %s25_s16 = sshll.u32 %s306_s1, 4  ;;  %s18_s13 = int_to_ptr.vmem [resolvable:$true] %s17_s13  ;;  %s26_s16 = int_to_ptr.hbm [resolvable:$true] %s25_s16 }
   0x4   :  { %20 = dma.hbm_to_vmem [thread:$0]  %s16_s11, 128, %s18_s13, [#allocation3]  }
   0x5   :  { %s277_s17 = smov [#allocation5]   ;;  %s278_s19 = smov 128  }
   0x6   :  { %s27_s18 = sshll.u32 %s277_s17, 4  ;;  %s279_s20 = smov 8   ;;  %s28_s18 = int_to_ptr.vmem [resolvable:$true] %s27_s18 }
   0x7   :  { %33 = dma.hbm_to_vmem [thread:$0]  %s26_s16, 6528, %s28_s18, [#allocation6], %s278_s19, %s278_s19, %s279_s20  }
   0x8   :  { %270 = dma.done.wait [#allocation3], 128  }
   0x9   :  { %271 = vsyncadd [#allocation3], 4294967168 }
   0xa   :  { %272 = dma.done.wait [#allocation6], 6528  }
   0xb   :  { %273 = vsyncadd [#allocation6], 4294960768  ;;  %v42_v0 = vld [vmem:[#allocation5] sm:$0xff]  ;;  %v59_v1 = vld [vmem:[#allocation5 + $0x88] sm:$0xff]  ;;  %vm128_vm0 = vcmask 64512   ;;  %s280_s0 = smov [#allocation7]  }
   0xc   :  { %v76_v2 = vld [vmem:[#allocation5 + $0x110] sm:$0xff]  ;;  %v127_v4 = vld [vmem:[#allocation2] sm:$0xff]  ;;  %v75_v5 = vld [vmem:[#allocation5 + $0x108] sm:$0xff]  ;;  %s179_s1 = sshll.u32 %s280_s0, 4  ;;  %s181_s23 = sshll.u32 %s307_s2, 4  ;;  %s180_s1 = int_to_ptr.vmem [resolvable:$true] %s179_s1  ;;  %s182_s23 = int_to_ptr.hbm [resolvable:$true] %s181_s23 }
   0xd   :  { %v93_v3 = vmul.f32 %v76_v2, %v59_v1  ;;  %v58_v6 = vld [vmem:[#allocation5 + $0x80] sm:$0xff]  ;;  %v92_v7 = vld [vmem:[#allocation5 + $0x190] sm:$0xff]  ;;  %v57_v11 = vld [vmem:[#allocation5 + $0x78] sm:$0xff] }
   0xe   :  { %v74_v8 = vld [vmem:[#allocation5 + $0x100] sm:$0xff]  ;;  %v109_v10 = vmul.f32 %v92_v7, %v75_v5  ;;  %v91_v12 = vld [vmem:[#allocation5 + $0x188] sm:$0xff]  ;;  %v73_v13 = vld [vmem:[#allocation5 + $0xf8] sm:$0xff] }
   0xf   :  { %v110_v9 = vadd.f32 %v93_v3, %v42_v0  ;;  %v108_v14 = vmul.f32 %v91_v12, %v74_v8  ;;  %v56_v15 = vld [vmem:[#allocation5 + $0x70] sm:$0xff]  ;;  %v90_v16 = vld [vmem:[#allocation5 + $0x180] sm:$0xff]  ;;  %v89_v20 = vld [vmem:[#allocation5 + $0x178] sm:$0xff] }
  0x10   :  { %v72_v17 = vld [vmem:[#allocation5 + $0xf0] sm:$0xff]  ;;  %v126_v18 = vadd.f32 %v109_v10, %v58_v6  ;;  %v107_v19 = vmul.f32 %v90_v16, %v73_v13  ;;  %v71_v21 = vld [vmem:[#allocation5 + $0xe8] sm:$0xff]  ;;  %v70_v26 = vld [vmem:[#allocation5 + $0xe0] sm:$0xff] }
  0x11   :  { %147 = vmatpush.msra.mxu0 %v110_v9  ;;  %v125_v22 = vadd.f32 %v108_v14, %v57_v11  ;;  %v55_v23 = vld [vmem:[#allocation5 + $0x68] sm:$0xff]  ;;  %v106_v24 = vmul.f32 %v89_v20, %v72_v17  ;;  %v88_v25 = vld [vmem:[#allocation5 + $0x170] sm:$0xff]  ;;  %v54_v30 = vld [vmem:[#allocation5 + $0x60] sm:$0xff] }
  0x12   :  { %192 = vmatmul.msk.f32.vlgmr.msra.gmra.mxu0 %vm128_vm0, %v127_v4  ;;  %153 = vmatpush.msra.mxu1 %v126_v18  ;;  %v124_v27 = vadd.f32 %v107_v19, %v56_v15  ;;  %v105_v28 = vmul.f32 %v88_v25, %v71_v21  ;;  %v87_v29 = vld [vmem:[#allocation5 + $0x168] sm:$0xff]  ;;  %v69_v31 = vld [vmem:[#allocation5 + $0xd8] sm:$0xff]  ;;  %v86_v32 = vld [vmem:[#allocation5 + $0x160] sm:$0xff] }
  0x13   :  { %v123_v33 = vadd.f32 %v106_v24, %v55_v23  ;;  %v104_v34 = vmul.f32 %v87_v29, %v70_v26  ;;  %v53_v35 = vld [vmem:[#allocation5 + $0x58] sm:$0xff]  ;;  %v68_v36 = vld [vmem:[#allocation5 + $0xd0] sm:$0xff]  ;;  %v103_v39 = vmul.f32 %v86_v32, %v69_v31  ;;  %v67_v41 = vld [vmem:[#allocation5 + $0xc8] sm:$0xff] }
  0x14   :  { %154 = vmatpush.msra.mxu1 %v125_v22  ;;  %v85_v37 = vld [vmem:[#allocation5 + $0x158] sm:$0xff]  ;;  %v122_v38 = vadd.f32 %v105_v28, %v54_v30  ;;  %v52_v40 = vld [vmem:[#allocation5 + $0x50] sm:$0xff]  ;;  %v51_v45 = vld [vmem:[#allocation5 + $0x48] sm:$0xff] }
  0x15   :  { %v84_v42 = vld [vmem:[#allocation5 + $0x150] sm:$0xff]  ;;  %v121_v43 = vadd.f32 %v104_v34, %v53_v35  ;;  %v102_v44 = vmul.f32 %v85_v37, %v68_v36  ;;  %v66_v46 = vld [vmem:[#allocation5 + $0xc0] sm:$0xff]  ;;  %v83_v47 = vld [vmem:[#allocation5 + $0x148] sm:$0xff]  ;;  %v120_v48 = vadd.f32 %v103_v39, %v52_v40 }
  0x16   :  { %155 = vmatpush.msra.mxu1 %v124_v27  ;;  %v101_v49 = vmul.f32 %v84_v42, %v67_v41  ;;  %v50_v50 = vld [vmem:[#allocation5 + $0x40] sm:$0xff]  ;;  %v65_v51 = vld [vmem:[#allocation5 + $0xb8] sm:$0xff]  ;;  %v100_v54 = vmul.f32 %v83_v47, %v66_v46  ;;  %v64_v56 = vld [vmem:[#allocation5 + $0xb0] sm:$0xff] }
  0x17   :  { %v82_v52 = vld [vmem:[#allocation5 + $0x140] sm:$0xff]  ;;  %v119_v53 = vadd.f32 %v102_v44, %v51_v45  ;;  %v49_v55 = vld [vmem:[#allocation5 + $0x38] sm:$0xff]  ;;  %v48_v60 = vld [vmem:[#allocation5 + $0x30] sm:$0xff] }
  0x18   :  { %156 = vmatpush.msra.mxu1 %v123_v33  ;;  %v81_v57 = vld [vmem:[#allocation5 + $0x138] sm:$0xff]  ;;  %v118_v58 = vadd.f32 %v101_v49, %v50_v50  ;;  %v99_v59 = vmul.f32 %v82_v52, %v65_v51  ;;  %v63_v61 = vld [vmem:[#allocation5 + $0xa8] sm:$0xff]  ;;  %v80_v62 = vld [vmem:[#allocation5 + $0x130] sm:$0xff]  ;;  %v117_v63 = vadd.f32 %v100_v54, %v49_v55 }
  0x19   :  { %v98_v0 = vmul.f32 %v81_v57, %v64_v56  ;;  %v47_v1 = vld [vmem:[#allocation5 + $0x28] sm:$0xff]  ;;  %v62_v2 = vld [vmem:[#allocation5 + $0xa0] sm:$0xff]  ;;  %v97_v5 = vmul.f32 %v80_v62, %v63_v61  ;;  %v45_v9 = vld [vmem:[#allocation5 + $0x18] sm:$0xff] }
  0x1a   :  { %157 = vmatpush.msra.mxu1 %v122_v38  ;;  %v79_v3 = vld [vmem:[#allocation5 + $0x128] sm:$0xff]  ;;  %v116_v4 = vadd.f32 %v99_v59, %v48_v60  ;;  %v46_v6 = vld [vmem:[#allocation5 + $0x20] sm:$0xff]  ;;  %v61_v12 = vld [vmem:[#allocation5 + $0x98] sm:$0xff] }
  0x1b   :  { %v115_v7 = vadd.f32 %v98_v0, %v47_v1  ;;  %v96_v8 = vmul.f32 %v79_v3, %v62_v2  ;;  %v114_v10 = vadd.f32 %v97_v5, %v46_v6  ;;  %v78_v13 = vld [vmem:[#allocation5 + $0x120] sm:$0xff]  ;;  %v44_v15 = vld [vmem:[#allocation5 + $0x10] sm:$0xff]  ;;  %v77_v17 = vld [vmem:[#allocation5 + $0x118] sm:$0xff] }
  0x1c   :  { %158 = vmatpush.msra.mxu1 %v121_v43  ;;  %v95_v14 = vmul.f32 %v78_v13, %v61_v12  ;;  %v60_v16 = vld [vmem:[#allocation5 + $0x90] sm:$0xff]  ;;  %v43_v20 = vld [vmem:[#allocation5 + $0x8] sm:$0xff] }
  0x1d   :  { %v113_v11 = vadd.f32 %v96_v8, %v45_v9  ;;  %v94_v19 = vmul.f32 %v77_v17, %v60_v16 }
  0x1e   :  { %159 = vmatpush.msra.mxu1 %v120_v48  ;;  %v112_v18 = vadd.f32 %v95_v14, %v44_v15 }
  0x1f   :  { %v111_v21 = vadd.f32 %v94_v19, %v43_v20 }
  0x20   :  { %160 = vmatpush.msra.mxu1 %v119_v53 }
  0x22   :  { %161 = vmatpush.msra.mxu1 %v118_v58 }
  0x24   :  { %162 = vmatpush.msra.mxu1 %v117_v63 }
  0x26   :  { %163 = vmatpush.msra.mxu1 %v116_v4 }
  0x28   :  { %164 = vmatpush.msra.mxu1 %v115_v7 }
  0x2a   :  { %165 = vmatpush.msra.mxu1 %v114_v10 }
  0x2c   :  { %166 = vmatpush.msra.mxu1 %v113_v11 }
  0x2e   :  { %167 = vmatpush.msra.mxu1 %v112_v18 }
  0x30   :  { %168 = vmatpush.msra.mxu1 %v111_v21 }
  0x8f   :  { %v149_v22 = vpop.f32.mrf.mxu0 }
  0x90   :  { %v152_v23 = vmax.f32 %v149_v22, 0.0 }
  0x92   :  { %169 = vmatmul.f32.vlgmr.msra.gmra.mxu1 %v152_v23 }
 0x10f   :  { %v170_v24 = vpop.f32.mrf.mxu1 }
 0x110   :  { %173 = vst [vmem:[#allocation7] sm:$0xff] %v170_v24 }
 0x111   :  { %184 = dma.vmem_to_hbm [thread:$0]  %s180_s1, 128, %s182_s23, [#allocation4]  }
 0x112   :  { %274 = dma.done.wait [#allocation4], 128  }
 0x113   :  { %275 = vsyncadd [#allocation4], 4294967168 }
 0x114   :  { %189 = vsyncpa [#allocation3], 1 }
 0x115   :  { %190 = vsyncpa [#allocation6], 1 }
 0x116   :  { %191 = vsyncpa [#allocation4], 1 }

</bundles_post_ra>
